<compile_context>
chip_gen: v5e
topology: v5e:2x2
jax: 0.10.0
libtpu: 0.0.40
codegen_flags: <defaults>
</compile_context>

<pallas_src>
import functools

import jax
import jax.numpy as jnp
from jax import lax
from jax.experimental import pallas as pl
from jax.experimental.pallas import tpu as pltpu

Q = 0.7
K = 0.5
TRAINSET_SIZE = 64  # synthetic; PyTorch default is 50000

NUM_PARTIALS = 2                       # leading "parallel" grid axis (v7x: 2 TCs/chip)
_VMEM_BUDGET_PER_BUF = 6 * 1024 * 1024  # per-pipeline-buffer byte target (safe on 64 MiB v7x VMEM)
_NEG_FILL = -1e30                       # inert under max / exp for padded class columns


def _round_up(x, m):
    return ((x + m - 1) // m) * m


def _gce_loss_kernel(logits_ref, targets_ref, w_ref, out_ref, acc_ref, *, q, k):
    j = pl.program_id(1)

    @pl.when(j == 0)
    def _init():
        acc_ref[...] = jnp.zeros_like(acc_ref)

    logits = logits_ref[...].astype(jnp.float32)            # (TILE_N, C_pad)
    tn, cp = logits.shape
    tgt = targets_ref[...]                                   # (TILE_N, 1) int32
    w = w_ref[...].astype(jnp.float32)                       # (TILE_N, 1)

    # log-softmax of the target class, without materializing the softmax.
    m = jnp.max(logits, axis=-1, keepdims=True)              # (TILE_N, 1)
    lse = jnp.log(jnp.sum(jnp.exp(logits - m), axis=-1, keepdims=True))
    col = lax.broadcasted_iota(jnp.int32, (tn, cp), 1)
    onehot = col == tgt                                      # (TILE_N, C_pad)
    z_t = jnp.sum(jnp.where(onehot, logits, 0.0), axis=-1, keepdims=True)

    # Yg ** q = exp(q * log Yg) = exp(q * (z_t - m - lse))
    yg_pow_q = jnp.exp(q * (z_t - m - lse))                  # (TILE_N, 1)

    # (1 - Yg^q)/q * w - (1 - k^q)/q * w  ==  (k^q - Yg^q)/q * w
    loss = (k ** q - yg_pow_q) * (1.0 / q) * w               # (TILE_N, 1)

    acc_ref[...] += jnp.sum(loss, keepdims=True)             # (1, 1)

    @pl.when(j == pl.num_programs(1) - 1)
    def _finalize():
        # Lane-dense store; JAX epilogue reads row 0 / col 0 of each block.
        out_ref[...] = jnp.broadcast_to(acc_ref[...], out_ref.shape)


def truncated_loss(logits, targets, indexes, weight, *, q=Q, k=K):
    """Pallas forward of TruncatedLoss.

    logits:  (N, C) float
    targets: (N,)   int class indices
    indexes: (N,)   int indices into `weight`
    weight:  (trainset_size, 1) float32 (non-trainable parameter)
    returns: scalar float32 mean loss
    """
    n, c = logits.shape
    dtype = logits.dtype
    itemsize = jnp.dtype(dtype).itemsize

    # Lane-dense class axis.
    c_pad = _round_up(c, 128)

    # Batch tile sized by a per-buffer VMEM budget; accounts for the 128-lane
    # padding of the (TILE_N, 1) target / weight streams in VMEM.
    row_bytes = c_pad * itemsize + 2 * 128 * 4
    tile_n = max(8, (_VMEM_BUDGET_PER_BUF // row_bytes) // 8 * 8)
    tile_n = min(tile_n, _round_up(n, 8))
    n_pad = _round_up(n, NUM_PARTIALS * tile_n)
    tiles_per_partial = n_pad // (NUM_PARTIALS * tile_n)

    # JAX glue: gather of the non-trainable per-sample weight + padding.
    # Padded rows get w = 0 (zero loss contribution); padded class columns get
    # a large negative fill (inert under max / exp).
    w = weight[indexes].reshape(n, 1).astype(jnp.float32)
    w_p = jnp.zeros((n_pad, 1), jnp.float32).at[:n].set(w)
    tgt_p = jnp.zeros((n_pad, 1), jnp.int32).at[:n].set(
        targets.astype(jnp.int32).reshape(n, 1))
    logits_p = jnp.full((n_pad, c_pad), _NEG_FILL, dtype=dtype).at[:n, :c].set(logits)

    row_map = lambda i, j: (i * tiles_per_partial + j, 0)

    out = pl.pallas_call(
        functools.partial(_gce_loss_kernel, q=q, k=k),
        out_shape=jax.ShapeDtypeStruct((NUM_PARTIALS * 8, 128), jnp.float32),
        grid_spec=pltpu.PrefetchScalarGridSpec(
            num_scalar_prefetch=0,
            grid=(NUM_PARTIALS, tiles_per_partial),
            in_specs=[
                pl.BlockSpec((tile_n, c_pad), row_map),
                pl.BlockSpec((tile_n, 1), row_map),
                pl.BlockSpec((tile_n, 1), row_map),
            ],
            out_specs=pl.BlockSpec((8, 128), lambda i, j: (i, 0)),
            scratch_shapes=[pltpu.VMEM((1, 1), jnp.float32)],
        ),
        compiler_params=pltpu.CompilerParams(
            dimension_semantics=("parallel", "arbitrary"),
            vmem_limit_bytes=32 * 1024 * 1024,
        ),
    )(logits_p, tgt_p, w_p)

    # Per-partial sums live at rows 0, 8, 16, ... column 0. Divide by the
    # *original* N exactly once.
    return jnp.sum(out[::8, 0]) / jnp.float32(n)


def truncated_loss_ref(logits, targets, indexes, weight, *, q=Q, k=K):
    """Pure-JAX reference matching the PyTorch forward."""
    p = jax.nn.softmax(logits.astype(jnp.float32), axis=1)
    yg = jnp.take_along_axis(p, targets[:, None].astype(jnp.int32), axis=1)
    w = weight[indexes].reshape(-1, 1)
    loss = (1.0 - yg ** q) / q * w - (1.0 - k ** q) / q * w
    return jnp.mean(loss)


if __name__ == "__main__":
    key = jax.random.PRNGKey(0)
    k_logits, k_tgt, k_idx = jax.random.split(key, 3)

    N, C = 8, 32
    logits = jax.random.normal(k_logits, (N, C), dtype=jnp.float32)
    targets = jax.random.randint(k_tgt, (N,), 0, C, dtype=jnp.int32)
    indexes = jax.random.randint(k_idx, (N,), 0, TRAINSET_SIZE, dtype=jnp.int32)

    # Deterministic parameter init (matches torch.ones(trainset_size, 1)).
    weight = jnp.ones((TRAINSET_SIZE, 1), dtype=jnp.float32)

    out = truncated_loss(logits, targets, indexes, weight)
    out = jax.block_until_ready(out)

    ref = truncated_loss_ref(logits, targets, indexes, weight)
    assert jnp.allclose(out, ref, atol=1e-5, rtol=1e-5), (out, ref)

    print("KERNEL_OK")
</pallas_src>

<mosaic_0001>
module attributes {stable_mosaic.version = 11 : i64} {
  func.func @_gce_loss_kernel(%arg0: i32, %arg1: i32, %arg2: memref<8x128xf32, #tpu.memory_space<vmem>>, %arg3: memref<8x1xi32, #tpu.memory_space<vmem>>, %arg4: memref<8x1xf32, #tpu.memory_space<vmem>>, %arg5: memref<8x128xf32, #tpu.memory_space<vmem>>, %arg6: memref<1x1xf32, #tpu.memory_space<vmem>>) attributes {dimension_semantics = [#tpu.dimension_semantics<parallel>, #tpu.dimension_semantics<arbitrary>], iteration_bounds = array<i64: 2, 1>, scalar_prefetch = 0 : i64, scratch_operands = 1 : i64, tpu.core_type = #tpu.core_type<tc>, window_params = [{transform_indices = @transform_0, window_bounds = array<i64: 8, 128>}, {transform_indices = @transform_1, window_bounds = array<i64: 8, 1>}, {transform_indices = @transform_2, window_bounds = array<i64: 8, 1>}, {transform_indices = @transform_3, window_bounds = array<i64: 8, 128>}]} {
    %c0_i32 = arith.constant 0 : i32
    %0 = arith.cmpi eq, %arg1, %c0_i32 : i32
    %1 = arith.extui %0 : i1 to i32
    %c0_i32_0 = arith.constant 0 : i32
    %2 = arith.cmpi ne, %1, %c0_i32_0 : i32
    scf.if %2 {
      %cst_19 = arith.constant 0.000000e+00 : f32
      %42 = vector.broadcast %cst_19 : f32 to vector<1x1xf32>
      %c0_20 = arith.constant 0 : index
      %c0_21 = arith.constant 0 : index
      %43 = vector.load %arg6[%c0_20, %c0_21] : memref<1x1xf32, #tpu.memory_space<vmem>>, vector<1x1xf32>
      tpu.vector_store %arg6[%c0_20, %c0_21], %42 {strides = array<i32>} : memref<1x1xf32, #tpu.memory_space<vmem>>, vector<1x1xf32>,
    } else {
    }
    %c0 = arith.constant 0 : index
    %c0_1 = arith.constant 0 : index
    %3 = vector.load %arg2[%c0, %c0_1] : memref<8x128xf32, #tpu.memory_space<vmem>>, vector<8x128xf32>
    %c0_2 = arith.constant 0 : index
    %c0_3 = arith.constant 0 : index
    %4 = vector.load %arg3[%c0_2, %c0_3] : memref<8x1xi32, #tpu.memory_space<vmem>>, vector<8x1xi32>
    %c0_4 = arith.constant 0 : index
    %c0_5 = arith.constant 0 : index
    %5 = vector.load %arg4[%c0_4, %c0_5] : memref<8x1xf32, #tpu.memory_space<vmem>>, vector<8x1xf32>
    %cst = arith.constant dense<0xFF800000> : vector<8xf32>
    %6 = vector.multi_reduction <maximumf>, %3, %cst [1] : vector<8x128xf32> to vector<8xf32>
    %7 = vector.shape_cast %6 : vector<8xf32> to vector<8x1xf32>
    %8 = vector.broadcast %7 : vector<8x1xf32> to vector<8x128xf32>
    %9 = arith.subf %3, %8 : vector<8x128xf32>
    %10 = math.exp %9 : vector<8x128xf32>
    %cst_6 = arith.constant dense<0.000000e+00> : vector<8xf32>
    %11 = vector.multi_reduction <add>, %10, %cst_6 [1] : vector<8x128xf32> to vector<8xf32>
    %12 = vector.shape_cast %11 : vector<8xf32> to vector<8x1xf32>
    %13 = math.log %12 : vector<8x1xf32>
    %14 = tpu.iota {dimensions = array<i32: 1>} : vector<8x128xi32>
    %15 = vector.broadcast %4 : vector<8x1xi32> to vector<8x128xi32>
    %16 = arith.cmpi eq, %14, %15 : vector<8x128xi32>
    %cst_7 = arith.constant 0.000000e+00 : f32
    %17 = vector.broadcast %cst_7 : f32 to vector<8x128xf32>
    %18 = arith.select %16, %3, %17 : vector<8x128xi1>, vector<8x128xf32>
    %cst_8 = arith.constant dense<0.000000e+00> : vector<8xf32>
    %19 = vector.multi_reduction <add>, %18, %cst_8 [1] : vector<8x128xf32> to vector<8xf32>
    %20 = vector.shape_cast %19 : vector<8xf32> to vector<8x1xf32>
    %21 = arith.subf %20, %7 : vector<8x1xf32>
    %22 = arith.subf %21, %13 : vector<8x1xf32>
    %cst_9 = arith.constant 0.699999988 : f32
    %23 = vector.broadcast %cst_9 : f32 to vector<8x1xf32>
    %24 = arith.mulf %23, %22 : vector<8x1xf32>
    %25 = math.exp %24 : vector<8x1xf32>
    %cst_10 = arith.constant 0.615572214 : f32
    %26 = vector.broadcast %cst_10 : f32 to vector<8x1xf32>
    %27 = arith.subf %26, %25 : vector<8x1xf32>
    %cst_11 = arith.constant 1.42857146 : f32
    %28 = vector.broadcast %cst_11 : f32 to vector<8x1xf32>
    %29 = arith.mulf %27, %28 : vector<8x1xf32>
    %30 = arith.mulf %29, %5 : vector<8x1xf32>
    %c0_12 = arith.constant 0 : index
    %c0_13 = arith.constant 0 : index
    %31 = vector.load %arg6[%c0_12, %c0_13] : memref<1x1xf32, #tpu.memory_space<vmem>>, vector<1x1xf32>
    %32 = vector.shape_cast %30 : vector<8x1xf32> to vector<1x8x1xf32>
    %cst_14 = arith.constant dense<0.000000e+00> : vector<1xf32>
    %33 = vector.multi_reduction <add>, %32, %cst_14 [1, 2] : vector<1x8x1xf32> to vector<1xf32>
    %34 = vector.shape_cast %33 : vector<1xf32> to vector<1x1x1xf32>
    %35 = vector.extract %34[0, 0, 0] : f32 from vector<1x1x1xf32>
    %36 = vector.broadcast %35 : f32 to vector<1x1xf32>
    %37 = arith.addf %31, %36 : vector<1x1xf32>
    %c0_15 = arith.constant 0 : index
    %c0_16 = arith.constant 0 : index
    %38 = vector.load %arg6[%c0_15, %c0_16] : memref<1x1xf32, #tpu.memory_space<vmem>>, vector<1x1xf32>
    tpu.vector_store %arg6[%c0_15, %c0_16], %37 {strides = array<i32>} : memref<1x1xf32, #tpu.memory_space<vmem>>, vector<1x1xf32>,
    %c0_i32_17 = arith.constant 0 : i32
    %39 = arith.cmpi eq, %arg1, %c0_i32_17 : i32
    %40 = arith.extui %39 : i1 to i32
    %c0_i32_18 = arith.constant 0 : i32
    %41 = arith.cmpi ne, %40, %c0_i32_18 : i32
    scf.if %41 {
      %c0_19 = arith.constant 0 : index
      %c0_20 = arith.constant 0 : index
      %42 = vector.load %arg6[%c0_19, %c0_20] : memref<1x1xf32, #tpu.memory_space<vmem>>, vector<1x1xf32>
      %43 = vector.shape_cast %42 : vector<1x1xf32> to vector<1x1xf32>
      %44 = vector.broadcast %43 : vector<1x1xf32> to vector<8x128xf32>
      %c0_21 = arith.constant 0 : index
      %c0_22 = arith.constant 0 : index
      %45 = vector.load %arg5[%c0_21, %c0_22] : memref<8x128xf32, #tpu.memory_space<vmem>>, vector<8x128xf32>
      tpu.vector_store %arg5[%c0_21, %c0_22], %44 {strides = array<i32>} : memref<8x128xf32, #tpu.memory_space<vmem>>, vector<8x128xf32>,
    } else {
    }
    return
  }
  func.func @transform_0(%arg0: i32, %arg1: i32) -> (i32, i32) {
    %c1_i32 = arith.constant 1 : i32
    %0 = arith.muli %arg0, %c1_i32 : i32
    %1 = arith.addi %0, %arg1 : i32
    %c0_i32 = arith.constant 0 : i32
    %c0_i32_0 = arith.constant 0 : i32
    return %1, %c0_i32 : i32, i32
  }
  func.func @transform_1(%arg0: i32, %arg1: i32) -> (i32, i32) {
    %c1_i32 = arith.constant 1 : i32
    %0 = arith.muli %arg0, %c1_i32 : i32
    %1 = arith.addi %0, %arg1 : i32
    %c0_i32 = arith.constant 0 : i32
    %c0_i32_0 = arith.constant 0 : i32
    return %1, %c0_i32 : i32, i32
  }
  func.func @transform_2(%arg0: i32, %arg1: i32) -> (i32, i32) {
    %c1_i32 = arith.constant 1 : i32
    %0 = arith.muli %arg0, %c1_i32 : i32
    %1 = arith.addi %0, %arg1 : i32
    %c0_i32 = arith.constant 0 : i32
    %c0_i32_0 = arith.constant 0 : i32
    return %1, %c0_i32 : i32, i32
  }
  func.func @transform_3(%arg0: i32, %arg1: i32) -> (i32, i32) {
    %c0_i32 = arith.constant 0 : i32
    %c0_i32_0 = arith.constant 0 : i32
    return %arg0, %c0_i32 : i32, i32
  }
}

</mosaic_0001>

<bundles_post_ra>
// kernel: tpu_custom_call.1
= control target key start
LH: loop header
LB: loop body
LE: loop exit
PB: predicated region body
PF: predicated region fallthrough
CT: control target
= control target key end

     0   :  { %8 = vsyncpa [#allocation4], 0  ;;  %s693_s0 = inlined_call_operand.vmem [shape: f32[16,128], index: 0, kind: input, shape index: {}]   ;;  %s694_s1 = inlined_call_operand.vmem [shape: s32[16,1], index: 1, kind: input, shape index: {}]   ;;  %s695_s2 = inlined_call_operand.vmem [shape: f32[16,1], index: 2, kind: input, shape index: {}]   ;;  %s696_s3 = inlined_call_operand.hbm [shape: f32[16,128], index: 3, kind: output, shape index: {}]  }
   0x1   :  { %10 = vsyncpa [#allocation4 + $0x1], 0  ;;  %s585_s12 = smov 0   ;;  %s587_s13 = smov 0  }
   0x2   :  { %s589_s14 = smov 0   ;;  %s591_s15 = smov 0  }
   0x3   :  { %s593_s16 = smov 0   ;;  %s595_s17 = smov 0  }
   0x4 LB: > { %s402_s18 = sadd.s32 4294967295, %s561_s17   ;;  %s403_s19 = sadd.s32 4294967294, %s561_s17   ;;  %s561_s17 = sphi %s595_s17, %s16_s17   ;;  %s557_s16 = sphi %s593_s16, %s703_s16   ;;  %s553_s15 = sphi %s591_s15, %s702_s15   ;;  %s549_s14 = sphi %s589_s14, %s701_s14   ;;  %s545_s13 = sphi %s587_s13, %s700_s13   ;;  %s541_s12 = sphi %s585_s12, %s699_s12  }
   0x5   : > { %s28_s20 = sadd.s32 1, %s557_s16  ;;  %s119_s21 = sadd.s32 1, %s549_s14 }
   0x6   : > { %p30_p0 = scmp.ge.s32.totalorder %s28_s20, 2  ;;  %p129_p1 = scmp.ne.s32.totalorder %s549_s14, %s545_s13 }
   0x7   : > { %p130_p2 = scmp.eq.s32.totalorder %s402_s18, 1  ;;  %p135_p3 = scmp.ne.s32.totalorder %s545_s13, %s541_s12 }
   0x8   : > { %s705_s20 = smov (%p30_p0, %s28_s20), 0  ;;  %p136_p5 = scmp.eq.s32.totalorder %s403_s19, 1 }
   0x9   : > { %p625_p4 = por %p130_p2, %p129_p1  ;;  %s116_s23 = ssub.s32 %s557_s16, %s705_s20 }
   0xa   : > { %p406_p6 = scmp.ge.s32.totalorder %s561_s17, 1  ;;  %p117_p7 = scmp.eq.s32.totalorder %s116_s23, 0 }
   0xb   : > { %p632_p8 = por %p136_p5, %p135_p3  ;;  %p181_p9 = scmp.lt.s32.totalorder %s561_s17, 3 }
   0xc   : > { %s638_s25 = scalar_select %p117_p7, %s549_s14, %s119_s21  }
   0xd   : > { %p182_p10 = pnand %p406_p6, %p181_p9 }
   0xe   : > { %p216_p11 = scmp.lt.s32.totalorder (!%p182_p10), %s553_s15, 1  ;;  %s212_s11 = sand.u32 (!%p182_p10), 1, %s545_s13  }
   0xf   : > { %185 = sbr.rel (%p182_p10) target bundleno = 583 (0x247), region = 32  ;;  %s407_s18 = sshll.u32 (!%p182_p10), %s212_s11, 3 }
  0x10   : > { %s412_s19 = sshll.u32 (!%p182_p10), %s553_s15, 3  ;;  %s503_s7 = scalar_lea.hbm (!%p182_p10), %s696_s3, 16 }
  0x14   : > { %v563_v0 = vmov 0   ;;  %s217_s26 = scalar_select %p216_p11, %s553_s15, 1  ;;  %v251_v7 = vlaneseq  ;;  %vm269_vm1 = vcmask 7168   ;;  %vm237_vm2 = vcmask 0  }
  0x15   : > { %474 = vset.pattern.permute.xlu0 %v563_v0  ;;  %475 = vset.pattern.permute.xlu2 %v563_v0  ;;  %v564_v25 = vmov 0.0  }
  0x16   : > { %s642_s27 = sshll.u32 %s217_s26, 3  ;;  %v252_v8 = vand.u32 127, %v251_v7  ;;  %238 = vst.msk [vmem:[#allocation2] sm:$0x1] %vm237_vm2, %v564_v25  ;;  %s306_s26 = scalar_lea.hbm %s696_s3, %s412_s19 }
  0x17   : > { %s219_s30 = scalar_lea.vmem %s693_s0, %s642_s27  ;;  %s225_s6 = scalar_lea.vmem %s694_s1, %s642_s27 }
  0x18   : > { %v239_v1 = vld [vmem:[%s219_s30] sm:$0xff]  ;;  %s231_s9 = scalar_lea.vmem %s695_s2, %s642_s27  ;;  %s214_s27 = scalar_lea.vmem [#allocation3], %s407_s18 }
  0x19   : > { %242 = vmax.xlane.f32.xlu0 %v239_v1  ;;  %v240_v2 = vld [vmem:[%s225_s6] sm:$0xff]  ;;  %s308_s28 = sshll.u32 %s214_s27, 4  ;;  %s310_s29 = sshll.u32 %s306_s26, 4  ;;  %s309_s28 = int_to_ptr.vmem [resolvable:$true] %s308_s28  ;;  %s311_s29 = int_to_ptr.hbm [resolvable:$true] %s310_s29 }
  0x1a   : > { %v241_v21 = vld [vmem:[%s231_s9] sm:$0xff]  ;;  %s296_s30 = scalar_lea.sflag [#allocation4], %s212_s11  ;;  %s497_s4 = sshra.s32 %s311_s29, 4  ;;  %s498_s4 = int_to_ptr.hbm [resolvable:$true] %s497_s4 }
  0x1b   : > { %s499_s5 = scalar_lea.hbm %s498_s4, 8  ;;  %p504_p1 = scmp.lt.s32.totalorder %s498_s4, %s696_s3 }
  0x1c   : > { %p500_p12 = scmp.ne.s32.totalorder %s498_s4, %s499_s5  ;;  %p505_p2 = scmp.lt.s32.totalorder %s503_s7, %s499_s5 }
  0x1d   : > { %v268_v33 = vld [vmem:[#allocation2] sm:$0x1] }
  0x1e   : > { %p501_p13 = pnand %p500_p12, %p625_p4  ;;  %p506_p3 = por %p505_p2, %p504_p1 }
  0x20   : > { %p502_p0 = pneg %p501_p13 }
  0x22   : > { %p507_p5 = pnand %p506_p3, %p502_p0 }
  0x2d   : > { %254 = vperm.xlu0 %474, %v240_v2  }
  0x8c   : > { %v243_v3 = vpop.xlane.xlu0 %242 }
  0x8d   : > { %v244_v4 = vsub.f32 %v239_v1, %v243_v3 }
  0x8f   : > { %v245_v5 = vmul.f32 1.442695, %v244_v4 }
  0x91   : > { %477 = vpow2.f32 %v245_v5 }
  0x97   : > { %v478_v6 = vpop.eup %477 }
  0x98   : > { %247 = vadd.xlane.f32.xlu1 %v478_v6 }
  0x9f   : > { %v255_v9 = vpop.permute.xlu0 %254 }
  0xa0   : > { %vm256_vm0 = vcmp.eq.s32.totalorder %v252_v8, %v255_v9 }
  0xa1   : > { %v257_v10 = vsel %vm256_vm0, %v239_v1, 0.0 }
  0xa2   : > { %258 = vadd.xlane.f32.xlu1 %v257_v10 }
 0x10b   : > { %v248_v11 = vpop.xlane.xlu1 %247 }
 0x10c   : > { %479 = vlog2.f32 %v248_v11 }
 0x112   : > { %v480_v12 = vpop.eup %479 }
 0x113   : > { %v250_v14 = vmul.f32 0.6931472, %v480_v12 }
 0x115   : > { %v259_v13 = vpop.xlane.xlu1 %258 }
 0x116   : > { %v260_v15 = vsub.f32 %v259_v13, %v243_v3 }
 0x118   : > { %v261_v16 = vsub.f32 %v260_v15, %v250_v14 }
 0x11a   : > { %v262_v17 = vmul.f32 0.7, %v261_v16 }
 0x11c   : > { %v263_v18 = vmul.f32 1.442695, %v262_v17 }
 0x11e   : > { %481 = vpow2.f32 %v263_v18 }
 0x124   : > { %v482_v19 = vpop.eup %481 }
 0x125   : > { %v265_v20 = vsub.f32 0.6155722, %v482_v19 }
 0x127   : > { %v266_v22 = vmul.f32 1.4285715, %v265_v20 }
 0x129   : > { %v267_v23 = vmul.f32 %v266_v22, %v241_v21 }
 0x12b   : > { %v270_v24 = vsel %vm269_vm1, %v267_v23, 0.0 }
 0x12c   : > { %271 = vadd.xlane.f32.xlu2 %v270_v24 }
 0x19f   : > { %v272_v26 = vpop.xlane.xlu2 %271 }
 0x1a0   : > { %v273_v27 = vrot.slane %v272_v26, 4 }
 0x1a2   : > { %v274_v28 = vadd.f32 %v273_v27, %v272_v26 }
 0x1a4   : > { %v275_v29 = vrot.slane %v274_v28, 2 }
 0x1a6   : > { %v276_v30 = vadd.f32 %v275_v29, %v274_v28 }
 0x1a8   : > { %v277_v31 = vrot.slane %v276_v30, 1 }
 0x1aa   : > { %v278_v32 = vadd.f32 %v277_v31, %v276_v30 }
 0x1ac   : > { %415 = vpush %v278_v32 }
 0x1dd   : > { %s416_s10 = spop %415 }
 0x1de   : > { %v280_v34 = vstv %s416_s10 }
 0x1df   : > { %v281_v35 = vadd.f32 %v280_v34, %v268_v33 }
 0x1e1   : > { %283 = vst.msk [vmem:[#allocation2] sm:$0x1] %vm237_vm2, %v281_v35 }
 0x1e8   : > { %v476_v36 = vld [vmem:[#allocation2] ss:$0 sm:$0xff] }
 0x1e9   : > { %291 = vperm.xlu2 %475, %v476_v36  }
 0x243   : > { %v292_v37 = vpop.permute.xlu2 %291 }
 0x244   : > { %294 = vst [vmem:[%s214_s27] sm:$0xff] %v292_v37 }
 0x245   : > { %510 = shalt.err (!%p507_p5)
}
 0x246   : > { %417 = dma.vmem_to_hbm [thread:$0]  (%p625_p4), %s309_s28, 128, %s311_s29, %s296_s30  }
 0x247 PF: > { %p423_p6 = scmp.ge.s32.totalorder %s561_s17, 2  ;;  %s322_s10 = sand.u32 1, %s541_s12  }
 0x248   : > { %s323_s11 = scalar_lea.sflag [#allocation4], %s322_s10 }
 0x249   : > { %p420_p7 = pnand %p423_p6, %p632_p8 }
 0x24b   : > { %p421_p9 = pneg %p420_p7 }
 0x24d   : > { %536 = dma.done.wait (%p421_p9), %s323_s11, 128  }
 0x24e   : > { %538 = vsyncadd (%p421_p9), %s323_s11, 4294967168  ;;  %s16_s17 = sadd.s32 1, %s561_s17   ;;  %s699_s12 = smov %s545_s13 }
 0x24f   : > { %p13_p10 = scmp.ge.s32.totalorder %s16_s17, 4   ;;  %s700_s13 = smov %s549_s14 }
 0x250   : > { %s701_s14 = smov %s638_s25  ;;  %s702_s15 = smov %s557_s16 }
 0x251   : > { %s703_s16 = smov %s705_s20  ;;  %15 = sbr.rel (!%p13_p10) target bundleno = 4 (0x4), region = 81 }
 0x256   :  { %329 = vsyncpa [#allocation4], 1 }
 0x257   :  { %331 = vsyncpa [#allocation4 + $0x1], 1 }

</bundles_post_ra>
